<compile_context>
chip_gen: v7x
topology: tpu7x:2x2x1
jax: 0.10.0
libtpu: 0.0.40
codegen_flags: <defaults>
</compile_context>

<pallas_src>
import jax
import jax.numpy as jnp
from jax.experimental import pallas as pl
from jax.experimental.pallas import tpu as pltpu


def _round_up(x: int, m: int) -> int:
    return ((x + m - 1) // m) * m


def scale_ensemble_kernel(x_ref, s_ref, b_ref, w_ref, fb_ref, o_ref):
    # x_ref: (TB, D)   s_ref/b_ref: (N, D)   w_ref: (D, O_pad) bf16   fb_ref: (1, O_pad)
    x = x_ref[...].astype(jnp.float32)
    n_members = s_ref.shape[0]

    # Ensemble of ScaleModules with the center pre-folded into the bias:
    #   (x - c)*s + b  ==  x*s + (b - c*s)
    # N is small and static -> unrolled straight-line VPU code; each (1, D)
    # param row broadcasts against the (TB, D) batch tile.
    acc = jnp.zeros(x.shape, jnp.float32)
    for i in range(n_members):
        s_i = s_ref[pl.ds(i, 1), :]
        b_i = b_ref[pl.ds(i, 1), :]
        z = x * s_i + b_i
        # leaky_relu(z, 0.1) == max(z, 0.1*z) for slope in (0, 1)
        acc = acc + jnp.maximum(z, 0.1 * z)

    # fc: Linear(D -> O) with the 1/N ensemble mean folded into w_ref.
    # bf16 operands feed the MXU natively; accumulate in f32.
    logits = jnp.dot(acc.astype(w_ref.dtype), w_ref[...],
                     preferred_element_type=jnp.float32)
    logits = logits + fb_ref[...]
    o_ref[...] = jnp.maximum(logits, 0.0).astype(o_ref.dtype)


def scale_ensemble(x, centers, scales, biases, fc_w, fc_b,
                   *, block_b=512, mxu_dtype=jnp.bfloat16):
    """x: (B, D); centers/scales/biases: (N, D); fc_w: (out_dim, D); fc_b: (out_dim,)."""
    B, D = x.shape
    N = centers.shape[0]
    out_dim = fc_w.shape[0]
    o_pad = _round_up(out_dim, 128)          # lane-dense output (full vst stores)

    # Fold the center into the bias:  (x - c)*s + b  ==  x*s + (b - c*s).
    s_eff = scales.astype(jnp.float32)                       # (N, D)
    b_eff = (biases - centers * scales).astype(jnp.float32)  # (N, D)

    # Fold the ensemble mean (1/N) into the fc weight, transpose for the MXU,
    # zero-pad output columns to o_pad (padded outputs are exactly 0 -> safe slice),
    # and store bf16 for the MXU / halved HBM+VMEM traffic.
    w_t = fc_w.T * (1.0 / float(N))                           # (D, out_dim)
    w_t = jnp.pad(w_t, ((0, 0), (0, o_pad - out_dim))).astype(mxu_dtype)   # (D, o_pad)
    fb = jnp.pad(fc_b, (0, o_pad - out_dim)).reshape(1, o_pad).astype(jnp.float32)

    # Batch tile: big (default 512 rows, MXU/M-friendly), multiple of 8 (sublane),
    # never larger than the (8-rounded) batch.  If one tile would cover the whole
    # batch, halve it so the "parallel" grid has >=2 steps (v7x dual-TC sharding).
    tb = max(8, min(_round_up(block_b, 8), _round_up(B, 8)))
    if B > 8 and pl.cdiv(B, tb) < 2:
        tb = max(8, _round_up((B + 1) // 2, 8))
    grid = (pl.cdiv(B, tb),)

    # Scoped VMEM sized from the real footprint (double-buffered pipeline bufs),
    # with headroom; v5e's default is only 16 MiB, v7x physical is 64 MiB.
    f32b = 4
    wb = jnp.dtype(mxu_dtype).itemsize
    footprint = (2 * tb * D * x.dtype.itemsize        # x tiles
                 + 2 * tb * o_pad * f32b              # out tiles
                 + 2 * 2 * N * D * f32b               # scales + folded biases
                 + 2 * D * o_pad * wb                 # weight
                 + 2 * o_pad * f32b)                  # fc bias row
    vmem_limit = int(min(max(2 * footprint + (2 << 20), 8 << 20), 48 << 20))

    out = pl.pallas_call(
        scale_ensemble_kernel,
        out_shape=jax.ShapeDtypeStruct((B, o_pad), jnp.float32),
        grid_spec=pl.GridSpec(
            grid=grid,
            in_specs=[
                pl.BlockSpec((tb, D), lambda i: (i, 0)),       # x: tiled over batch
                pl.BlockSpec((N, D), lambda i: (0, 0)),        # scales: VMEM-resident
                pl.BlockSpec((N, D), lambda i: (0, 0)),        # folded biases
                pl.BlockSpec((D, o_pad), lambda i: (0, 0)),    # fc weight (bf16, /N, padded)
                pl.BlockSpec((1, o_pad), lambda i: (0, 0)),    # fc bias (padded)
            ],
            out_specs=pl.BlockSpec((tb, o_pad), lambda i: (i, 0)),
        ),
        compiler_params=pltpu.CompilerParams(
            dimension_semantics=("parallel",),
            vmem_limit_bytes=vmem_limit),
    )(x, s_eff, b_eff, w_t, fb)

    return out[:, :out_dim]


def scale_ensemble_ref(x, centers, scales, biases, fc_w, fc_b):
    """Pure-JAX reference mirroring the PyTorch forward (scale_dim == 2)."""
    z = (x[:, None, :] - centers[None, :, :]) * scales[None, :, :] + biases[None, :, :]
    resp = jnp.where(z >= 0, z, 0.1 * z)               # leaky_relu(0.1)
    feats = resp.mean(axis=1)                           # sum(responses) / N
    out = feats @ fc_w.T + fc_b                         # nn.Linear
    return jnp.maximum(out, 0.0)                        # ReLU


if __name__ == "__main__":
    # Small shapes consistent with the module: N ensemble members (rows of
    # field_centers), feature dim D, output dim O, batch B, scale_dim = 2.
    B, N, D, OUT = 32, 4, 32, 16

    key = jax.random.PRNGKey(0)
    k_x, k_c, k_s, k_b, k_w, k_fb = jax.random.split(key, 6)

    x = jax.random.normal(k_x, (B, D), jnp.float32)               # semantic_vec
    field_centers = jax.random.normal(k_c, (N, D), jnp.float32)

    # Parameters (PyTorch inits scale=1 / bias=0; perturbed deterministically
    # so the broadcast path is exercised).  xdim==2: (1, D) per module.
    scales = 1.0 + 0.1 * jax.random.normal(k_s, (N, D), jnp.float32)
    biases = 0.1 * jax.random.normal(k_b, (N, D), jnp.float32)
    fc_w = 0.2 * jax.random.normal(k_w, (OUT, D), jnp.float32)     # nn.Linear(D, OUT).weight
    fc_b = 0.1 * jax.random.normal(k_fb, (OUT,), jnp.float32)      # nn.Linear(D, OUT).bias

    out = scale_ensemble(x, field_centers, scales, biases, fc_w, fc_b)
    out = jax.block_until_ready(out)

    ref = scale_ensemble_ref(x, field_centers, scales, biases, fc_w, fc_b)
    assert out.shape == (B, OUT)
    # bf16 MXU operands -> loosened tolerance vs the f32 reference.
    assert jnp.allclose(out, ref, atol=2e-2, rtol=2e-2), "mismatch vs reference"

    print("KERNEL_OK")
</pallas_src>

<mosaic_0001>
module attributes {stable_mosaic.version = 11 : i64} {
  func.func @scale_ensemble_kernel(%arg0: i32, %arg1: memref<16x32xf32, #tpu.memory_space<vmem>>, %arg2: memref<4x32xf32, #tpu.memory_space<vmem>>, %arg3: memref<4x32xf32, #tpu.memory_space<vmem>>, %arg4: memref<32x128xbf16, #tpu.memory_space<vmem>>, %arg5: memref<1x128xf32, #tpu.memory_space<vmem>>, %arg6: memref<16x128xf32, #tpu.memory_space<vmem>>) attributes {dimension_semantics = [#tpu.dimension_semantics<parallel>], iteration_bounds = array<i64: 2>, scalar_prefetch = 0 : i64, scratch_operands = 0 : i64, tpu.core_type = #tpu.core_type<tc>, window_params = [{transform_indices = @transform_0, window_bounds = array<i64: 16, 32>}, {pipeline_mode = #tpu.pipeline_mode<synchronous>, transform_indices = @transform_1, window_bounds = array<i64: 4, 32>}, {pipeline_mode = #tpu.pipeline_mode<synchronous>, transform_indices = @transform_2, window_bounds = array<i64: 4, 32>}, {pipeline_mode = #tpu.pipeline_mode<synchronous>, transform_indices = @transform_3, window_bounds = array<i64: 32, 128>}, {pipeline_mode = #tpu.pipeline_mode<synchronous>, transform_indices = @transform_4, window_bounds = array<i64: 1, 128>}, {transform_indices = @transform_5, window_bounds = array<i64: 16, 128>}]} {
    %c0 = arith.constant 0 : index
    %c0_0 = arith.constant 0 : index
    %0 = vector.load %arg1[%c0, %c0_0] : memref<16x32xf32, #tpu.memory_space<vmem>>, vector<16x32xf32>
    %cst = arith.constant 0.000000e+00 : f32
    %1 = vector.broadcast %cst : f32 to vector<16x32xf32>
    %c0_1 = arith.constant 0 : index
    %c0_2 = arith.constant 0 : index
    %2 = vector.load %arg2[%c0_1, %c0_2] : memref<4x32xf32, #tpu.memory_space<vmem>>, vector<1x32xf32>
    %c0_3 = arith.constant 0 : index
    %c0_4 = arith.constant 0 : index
    %3 = vector.load %arg3[%c0_3, %c0_4] : memref<4x32xf32, #tpu.memory_space<vmem>>, vector<1x32xf32>
    %4 = vector.broadcast %2 : vector<1x32xf32> to vector<16x32xf32>
    %5 = arith.mulf %0, %4 : vector<16x32xf32>
    %6 = vector.broadcast %3 : vector<1x32xf32> to vector<16x32xf32>
    %7 = arith.addf %5, %6 : vector<16x32xf32>
    %cst_5 = arith.constant 1.000000e-01 : f32
    %8 = vector.broadcast %cst_5 : f32 to vector<16x32xf32>
    %9 = arith.mulf %8, %7 : vector<16x32xf32>
    %10 = arith.maximumf %7, %9 : vector<16x32xf32>
    %11 = arith.addf %1, %10 : vector<16x32xf32>
    %c1 = arith.constant 1 : index
    %c0_6 = arith.constant 0 : index
    %12 = vector.load %arg2[%c1, %c0_6] : memref<4x32xf32, #tpu.memory_space<vmem>>, vector<1x32xf32>
    %c1_7 = arith.constant 1 : index
    %c0_8 = arith.constant 0 : index
    %13 = vector.load %arg3[%c1_7, %c0_8] : memref<4x32xf32, #tpu.memory_space<vmem>>, vector<1x32xf32>
    %14 = vector.broadcast %12 : vector<1x32xf32> to vector<16x32xf32>
    %15 = arith.mulf %0, %14 : vector<16x32xf32>
    %16 = vector.broadcast %13 : vector<1x32xf32> to vector<16x32xf32>
    %17 = arith.addf %15, %16 : vector<16x32xf32>
    %cst_9 = arith.constant 1.000000e-01 : f32
    %18 = vector.broadcast %cst_9 : f32 to vector<16x32xf32>
    %19 = arith.mulf %18, %17 : vector<16x32xf32>
    %20 = arith.maximumf %17, %19 : vector<16x32xf32>
    %21 = arith.addf %11, %20 : vector<16x32xf32>
    %c2 = arith.constant 2 : index
    %c0_10 = arith.constant 0 : index
    %22 = vector.load %arg2[%c2, %c0_10] : memref<4x32xf32, #tpu.memory_space<vmem>>, vector<1x32xf32>
    %c2_11 = arith.constant 2 : index
    %c0_12 = arith.constant 0 : index
    %23 = vector.load %arg3[%c2_11, %c0_12] : memref<4x32xf32, #tpu.memory_space<vmem>>, vector<1x32xf32>
    %24 = vector.broadcast %22 : vector<1x32xf32> to vector<16x32xf32>
    %25 = arith.mulf %0, %24 : vector<16x32xf32>
    %26 = vector.broadcast %23 : vector<1x32xf32> to vector<16x32xf32>
    %27 = arith.addf %25, %26 : vector<16x32xf32>
    %cst_13 = arith.constant 1.000000e-01 : f32
    %28 = vector.broadcast %cst_13 : f32 to vector<16x32xf32>
    %29 = arith.mulf %28, %27 : vector<16x32xf32>
    %30 = arith.maximumf %27, %29 : vector<16x32xf32>
    %31 = arith.addf %21, %30 : vector<16x32xf32>
    %c3 = arith.constant 3 : index
    %c0_14 = arith.constant 0 : index
    %32 = vector.load %arg2[%c3, %c0_14] : memref<4x32xf32, #tpu.memory_space<vmem>>, vector<1x32xf32>
    %c3_15 = arith.constant 3 : index
    %c0_16 = arith.constant 0 : index
    %33 = vector.load %arg3[%c3_15, %c0_16] : memref<4x32xf32, #tpu.memory_space<vmem>>, vector<1x32xf32>
    %34 = vector.broadcast %32 : vector<1x32xf32> to vector<16x32xf32>
    %35 = arith.mulf %0, %34 : vector<16x32xf32>
    %36 = vector.broadcast %33 : vector<1x32xf32> to vector<16x32xf32>
    %37 = arith.addf %35, %36 : vector<16x32xf32>
    %cst_17 = arith.constant 1.000000e-01 : f32
    %38 = vector.broadcast %cst_17 : f32 to vector<16x32xf32>
    %39 = arith.mulf %38, %37 : vector<16x32xf32>
    %40 = arith.maximumf %37, %39 : vector<16x32xf32>
    %41 = arith.addf %31, %40 : vector<16x32xf32>
    %42 = arith.truncf %41 : vector<16x32xf32> to vector<16x32xbf16>
    %c0_18 = arith.constant 0 : index
    %c0_19 = arith.constant 0 : index
    %43 = vector.load %arg4[%c0_18, %c0_19] : memref<32x128xbf16, #tpu.memory_space<vmem>>, vector<32x128xbf16>
    %cst_20 = arith.constant dense<0.000000e+00> : vector<16x128xf32>
    %44 = tpu.matmul %42, %43, %cst_20 {dimension_numbers = #tpu.dot_dimension_numbers<[1], [0], [0], [1], [0, 0, 1, 1], [], []>} : vector<16x32xbf16>, vector<32x128xbf16>, vector<16x128xf32> -> vector<16x128xf32>
    %c0_21 = arith.constant 0 : index
    %c0_22 = arith.constant 0 : index
    %45 = vector.load %arg5[%c0_21, %c0_22] : memref<1x128xf32, #tpu.memory_space<vmem>>, vector<1x128xf32>
    %46 = vector.broadcast %45 : vector<1x128xf32> to vector<16x128xf32>
    %47 = arith.addf %44, %46 : vector<16x128xf32>
    %cst_23 = arith.constant 0.000000e+00 : f32
    %48 = vector.broadcast %cst_23 : f32 to vector<16x128xf32>
    %49 = arith.maximumf %47, %48 : vector<16x128xf32>
    %c0_24 = arith.constant 0 : index
    %c0_25 = arith.constant 0 : index
    %50 = vector.load %arg6[%c0_24, %c0_25] : memref<16x128xf32, #tpu.memory_space<vmem>>, vector<16x128xf32>
    tpu.vector_store %arg6[%c0_24, %c0_25], %49 {strides = array<i32>} : memref<16x128xf32, #tpu.memory_space<vmem>>, vector<16x128xf32>,
    return
  }
  func.func @transform_0(%arg0: i32) -> (i32, i32) {
    %c0_i32 = arith.constant 0 : i32
    %c0_i32_0 = arith.constant 0 : i32
    return %arg0, %c0_i32 : i32, i32
  }
  func.func @transform_1(%arg0: i32) -> (i32, i32) {
    %c0_i32 = arith.constant 0 : i32
    %c0_i32_0 = arith.constant 0 : i32
    %c0_i32_1 = arith.constant 0 : i32
    return %c0_i32, %c0_i32_0 : i32, i32
  }
  func.func @transform_2(%arg0: i32) -> (i32, i32) {
    %c0_i32 = arith.constant 0 : i32
    %c0_i32_0 = arith.constant 0 : i32
    %c0_i32_1 = arith.constant 0 : i32
    return %c0_i32, %c0_i32_0 : i32, i32
  }
  func.func @transform_3(%arg0: i32) -> (i32, i32) {
    %c0_i32 = arith.constant 0 : i32
    %c0_i32_0 = arith.constant 0 : i32
    %c0_i32_1 = arith.constant 0 : i32
    return %c0_i32, %c0_i32_0 : i32, i32
  }
  func.func @transform_4(%arg0: i32) -> (i32, i32) {
    %c0_i32 = arith.constant 0 : i32
    %c0_i32_0 = arith.constant 0 : i32
    %c0_i32_1 = arith.constant 0 : i32
    return %c0_i32, %c0_i32_0 : i32, i32
  }
  func.func @transform_5(%arg0: i32) -> (i32, i32) {
    %c0_i32 = arith.constant 0 : i32
    %c0_i32_0 = arith.constant 0 : i32
    return %arg0, %c0_i32 : i32, i32
  }
}

</mosaic_0001>

<bundles_post_ra>
// kernel: tpu_custom_call.1
= control target key start
LH: loop header
LB: loop body
LE: loop exit
PB: predicated region body
PF: predicated region fallthrough
CT: control target
= control target key end

     0   :  { %s1104_s0 = inlined_call_operand.hbm [shape: f32[32,32], index: 0, kind: input, shape index: {}]   ;;  %s1105_s1 = inlined_call_operand.hbm [shape: f32[4,32], index: 1, kind: input, shape index: {}]   ;;  %s1106_s2 = inlined_call_operand.vmem [shape: f32[4,32], index: 2, kind: input, shape index: {}]   ;;  %s1107_s3 = inlined_call_operand.hbm [shape: bf16[32,128], index: 3, kind: input, shape index: {}]   ;;  %s1108_s4 = inlined_call_operand.vmem [shape: f32[1,128], index: 4, kind: input, shape index: {}]   ;;  %s1109_s5 = inlined_call_operand.hbm [shape: f32[32,128], index: 5, kind: output, shape index: {}]  }
   0x1   :  { %1115 = sst [smem:[#allocation13_spill]] %s1105_s1 }
   0x2   :  { %10 = vsyncpa [#allocation3], 0 }
   0x3   :  { %12 = vsyncpa [#allocation3 + $0x1], 0 }
   0x4   :  { %13 = vsyncpa [#allocation6], 0 }
   0x5   :  { %14 = vsyncpa [#allocation4], 0 }
   0x6   :  { %16 = vsyncpa [#allocation4 + $0x1], 0  ;;  %s854_s18 = smov 0   ;;  %s856_s19 = smov 0  }
   0x7   :  { %s858_s20 = smov 0   ;;  %s860_s21 = smov 0  }
   0x8 LB: > { %s875_s22 = sadd.s32 4294967295, %s810_s21   ;;  %s534_s23 = sadd.s32 4294967294, %s810_s21   ;;  %s810_s21 = sphi %s860_s21, %s1138_s21   ;;  %s806_s20 = sphi %s858_s20, %s1137_s20   ;;  %s802_s19 = sphi %s856_s19, %s1136_s19   ;;  %s798_s18 = sphi %s854_s18, %s1135_s18  }
   0x9   : > { %s879_s24 = sadd.s32 1, %s810_s21   ;;  %s29_s25 = sadd.s32 1, %s806_s20 }
   0xa   : > { %s26_s26 = ssub.s32 %s810_s21, %s879_s24  ;;  %p36_p0 = scmp.ne.s32.totalorder %s806_s20, %s802_s19 }
   0xb   : > { %p27_p1 = scmp.eq.s32.totalorder %s26_s26, 0  ;;  %p37_p2 = scmp.eq.s32.totalorder %s810_s21, 0 }
   0xc   : > { %p42_p3 = scmp.ne.s32.totalorder %s802_s19, %s798_s18  ;;  %p1110_p4 = scmp.eq.s32.totalorder %s875_s22, 0 }
   0xd   : > { %s891_s27 = scalar_select %p27_p1, %s806_s20, %s29_s25  }
   0xe   : > { %p893_p5 = por %p37_p2, %p36_p0  ;;  %p899_p6 = por %p1110_p4, %p42_p3 }
   0xf   : > { %1116 = sst [smem:[#allocation12_spill]] %s891_s27  ;;  %p150_p7 = scmp.eq.s32.totalorder %s875_s22, 1 }
  0x10   : > { %s1118_s29 = scalar_select %p899_p6, 1, 0 }
  0x11   : > { %p156_p8 = scmp.eq.s32.totalorder %s534_s23, 1  ;;  %p535_p9 = scmp.ge.s32.totalorder %s810_s21, 1 }
  0x12   : > { %p163_p10 = scmp.lt.s32.totalorder %s810_s21, 3  ;;  %p906_p11 = por %p150_p7, %p36_p0 }
  0x13   : > { %p910_p12 = por %p156_p8, %p42_p3  ;;  %s812_s8 = smov [#allocation5]  }
  0x14   : > { %s1119_s30 = scalar_select %p906_p11, 1, 0 }
  0x15   : > { %s1120_s6 = scalar_select %p910_p12, 1, 0 }
  0x16   : > { %p914_p13 = pnand %p535_p9, %p163_p10  ;;  %s176_s9 = sshll.u32 %s812_s8, 4  ;;  %s177_s9 = int_to_ptr.vmem [resolvable:$true] %s176_s9 }
  0x17   : > { %p606_p4 = scmp.lt.s32.totalorder %s810_s21, 2  ;;  %p1122_p0 = scmp.eq.s32.totalorder %s875_s22, 0 }
  0x18   : > { %s1121_s7 = scalar_select %p914_p13, 1, 0 }
  0x19   : > { %p589_p2 = pneg %p914_p13  ;;  %p930_p3 = pnand %p606_p4, %p893_p5 }
  0x1a   : > { %s813_s12 = smov [#allocation7]   ;;  %s1125_s1 = sld [smem:[#allocation13_spill]] }
  0x1b   : > { %p924_p7 = pnand %p589_p2, %p1122_p0  ;;  %s189_s13 = sshll.u32 %s813_s12, 4  ;;  %s934_s13 = int_to_ptr.vmem [resolvable:$true] %s189_s13 }
  0x1c   : > { %s1124_s11 = scalar_select %p930_p3, 1, 0 }
  0x1d   : > { %p656_p9 = pneg %p924_p7 }
  0x20   : > { %s654_s16 = scalar_lea.hbm %s1125_s1, 64 }
  0x21   : > { %p655_p8 = scmp.ne.s32.totalorder %s1125_s1, %s654_s16  ;;  %p661_p10 = scmp.lt.u32.totalorder %s654_s16, %s1125_s1 }
  0x23   : > { %p657_p4 = pnand %p656_p9, %p655_p8 }
  0x25   : > { %p658_p5 = pneg %p657_p4 }
  0x27   : > { %p663_p2 = pnand %p661_p10, %p658_p5 }
  0x29   : > { %666 = shalt.err (!%p663_p2)
}
  0x2a   : > { %s667_s28 = scalar_lea.vmem %s177_s9, 64  ;;  %p675_p11 = scmp.lt.s32.totalorder %s177_s9, %s177_s9 }
  0x2b   : > { %p668_p0 = scmp.ne.s32.totalorder %s177_s9, %s667_s28  ;;  %p676_p6 = scmp.lt.s32.totalorder %s667_s28, %s667_s28 }
  0x2d   : > { %p670_p1 = pnand %p668_p0, %p656_p9  ;;  %p677_p13 = por %p676_p6, %p675_p11 }
  0x2f   : > { %p671_p12 = pneg %p670_p1 }
  0x31   : > { %p678_p3 = pnand %p677_p13, %p671_p12 }
  0x33   : > { %681 = shalt.err (!%p678_p3)
}
  0x34   : > { %592 = dma.hbm_to_vmem [thread:$0]  (!%p924_p7), %s1125_s1, 64, %s177_s9, [#allocation6]  }
  0x35   : > { %s206_s14 = sand.u32 1, %s806_s20   ;;  %s682_s17 = scalar_lea.hbm %s1107_s3, 256 }
  0x36   : > { %p683_p1 = scmp.ne.s32.totalorder %s1107_s3, %s682_s17  ;;  %p689_p12 = scmp.lt.u32.totalorder %s682_s17, %s1107_s3 }
  0x38   : > { %p685_p6 = pnand %p683_p1, %p656_p9 }
  0x3a   : > { %p686_p11 = pneg %p685_p6 }
  0x3c   : > { %p691_p13 = pnand %p689_p12, %p686_p11 }
  0x3e   : > { %694 = shalt.err (!%p691_p13)
}
  0x3f   : > { %s695_s9 = scalar_lea.vmem %s934_s13, 256  ;;  %p703_p5 = scmp.lt.s32.totalorder %s934_s13, %s934_s13 }
  0x40   : > { %p696_p3 = scmp.ne.s32.totalorder %s934_s13, %s695_s9  ;;  %p704_p10 = scmp.lt.s32.totalorder %s695_s9, %s695_s9 }
  0x42   : > { %p698_p8 = pnand %p696_p3, %p656_p9  ;;  %p705_p2 = por %p704_p10, %p703_p5 }
  0x44   : > { %p699_p4 = pneg %p698_p8 }
  0x46   : > { %p706_p0 = pnand %p705_p2, %p699_p4 }
  0x48   : > { %709 = shalt.err (!%p706_p0)
}
  0x49   : > { %s814_s8 = smov 64   ;;  %s815_s12 = smov 4  }
  0x4a   : > { %595 = dma.hbm_to_vmem [thread:$0]  (!%p924_p7), %s1107_s3, 256, %s934_s13, [#allocation6], %s814_s8, %s814_s8, %s815_s12  }
  0x4b   : > { %s539_s17 = sshll.u32 %s206_s14, 4  ;;  %s564_s23 = sshll.u32 %s810_s21, 8 }
  0x4c   : > { %s988_s28 = scalar_lea.hbm %s1104_s0, %s564_s23  ;;  %s210_s9 = scalar_lea.vmem [#allocation2], %s539_s17 }
  0x4d   : > { %s217_s1 = sshll.u32 %s210_s9, 4  ;;  %s992_s10 = scalar_lea.sflag [#allocation3], %s206_s14  ;;  %s990_s1 = int_to_ptr.vmem [resolvable:$true] %s217_s1 }
  0x4e   : > { %s710_s27 = scalar_lea.hbm %s988_s28, 256  ;;  %p1126_p7 = scmp.ne.s32.totalorder %s1124_s11, 0 }
  0x4f   : > { %p711_p9 = scmp.ne.s32.totalorder %s988_s28, %s710_s27  ;;  %s715_s12 = scalar_lea.hbm %s1104_s0, 512 }
  0x50   : > { %p712_p1 = pneg %p1126_p7  ;;  %p716_p12 = scmp.lt.u32.totalorder %s988_s28, %s1104_s0 }
  0x51   : > { %p717_p13 = scmp.lt.u32.totalorder %s715_s12, %s710_s27  ;;  %p719_p8 = scmp.lt.u32.totalorder %s710_s27, %s988_s28 }
  0x52   : > { %p713_p6 = pnand %p712_p1, %p711_p9 }
  0x53   : > { %p718_p3 = por %p717_p13, %p716_p12 }
  0x54   : > { %p714_p11 = pneg %p713_p6 }
  0x55   : > { %p720_p4 = por %p719_p8, %p718_p3 }
  0x57   : > { %p721_p5 = pnand %p720_p4, %p714_p11 }
  0x59   : > { %724 = shalt.err (!%p721_p5)
}
  0x5a   : > { %s725_s14 = scalar_lea.vmem %s990_s1, 256  ;;  %s816_s17 = smov [#allocation2]  }
  0x5b   : > { %p726_p10 = scmp.ne.s32.totalorder %s990_s1, %s725_s14  ;;  %s730_s23 = sshll.u32 %s816_s17, 4  ;;  %s731_s23 = int_to_ptr.vmem [resolvable:$false] %s730_s23 }
  0x5c   : > { %s732_s25 = scalar_lea.vmem %s731_s23, 512  ;;  %p733_p9 = scmp.lt.s32.totalorder %s990_s1, %s731_s23 }
  0x5d   : > { %p728_p2 = pnand %p726_p10, %p712_p1  ;;  %p734_p6 = scmp.lt.s32.totalorder %s732_s25, %s725_s14 }
  0x5f   : > { %p729_p0 = pneg %p728_p2  ;;  %p735_p12 = por %p734_p6, %p733_p9 }
  0x61   : > { %p736_p13 = pnand %p735_p12, %p729_p0 }
  0x63   : > { %739 = shalt.err (!%p736_p13)
}
  0x64   : > { %s817_s27 = smov 128   ;;  %s818_s26 = smov 8  }
  0x65   : > { %599 = dma.hbm_to_vmem [thread:$0]  (!%p1126_p7), %s988_s28, 256, %s990_s1, %s992_s10, %s817_s27, %s817_s27, %s818_s26  }
  0x66   : > { %p1127_p1 = scmp.ne.s32.totalorder %s1121_s7, 0 }
  0x67   : > { %s1023_s9 = sand.u32 (!%p1127_p1), 1, %s802_s19   ;;  %p1128_p11 = scmp.ne.s32.totalorder (!%p1127_p1), %s1118_s29, 0 }
  0x68   : > { %229 = sbr.rel (%p1127_p1) target bundleno = 367 (0x16f), region = 40  ;;  %s543_s13 = sshll.u32 (!%p1127_p1), %s1023_s9, 4 }
  0x69   : > { %s232_s8 = scalar_lea.sflag (!%p1127_p1), [#allocation3], %s1023_s9  ;;  %s235_s12 = scalar_lea.vmem (!%p1127_p1), [#allocation2], %s543_s13 }
  0x6f   : > { %785 = dma.done.wait (%p1128_p11), %s232_s8, 256  }
  0x70   : > { %787 = vsyncadd (%p1128_p11), %s232_s8, 4294967040  ;;  %p1129_p7 = scmp.eq.s32.totalorder %s875_s22, 0 }
  0x72   : > { %789 = dma.done.wait (%p1129_p7), [#allocation6], 320   ;;  %p1130_p3 = pmov %p1129_p7 }
  0x73   : > { %v819_v0 = vmov 0.0   ;;  %vm820_vm0 = vmmov 0   ;;  %v652_v1 = vld [vmem:[#allocation7] sm:$0xff]   ;;  %v653_v2 = vld [vmem:[#allocation7 + $0x8] sm:$0xff]   ;;  %v547_v5 = vld [vmem:[#allocation5] ss:$0 sm:$0xff] }
  0x74   : > { %791 = vsyncadd (%p1130_p3), [#allocation6], 4294966976  ;;  %569 = vmatprep.subr.bf16.mxu0 %v819_v0  ;;  %573 = vmatprep.mubr.msk.bf16.mxu0 %vm820_vm0, %v819_v0  ;;  %v273_v3 = vld [vmem:[%s235_s12] sm:$0xff]  ;;  %v274_v4 = vld [vmem:[%s235_s12 + $0x8] sm:$0xff]  ;;  %vm379_vm1 = vcmask 261120   ;;  %s269_s23 = scalar_lea.vmem [#allocation8], %s543_s13 }
  0x75   : > { %570 = vmatpush3.bf16.msra.mxu0 %v652_v1  ;;  %v548_v6 = vld [vmem:[%s1106_s2] ss:$0 sm:$0xff]  ;;  %v281_v7 = vmul.f32 %v547_v5, %v273_v3  ;;  %v282_v8 = vmul.f32 %v547_v5, %v274_v4  ;;  %v549_v9 = vld [vmem:[#allocation5 + $0x1] ss:$0 sm:$0xff]  ;;  %v551_v13 = vld [vmem:[#allocation5 + $0x2] ss:$0 sm:$0xff] }
  0x76   : > { %571 = vmatprep.subr.bf16.mxu0 %v819_v0  ;;  %v550_v10 = vld [vmem:[%s1106_s2 + $0x1] ss:$0 sm:$0xff]  ;;  %v301_v11 = vmul.f32 %v549_v9, %v273_v3  ;;  %v302_v12 = vmul.f32 %v549_v9, %v274_v4  ;;  %v552_v14 = vld [vmem:[%s1106_s2 + $0x2] ss:$0 sm:$0xff]  ;;  %v553_v15 = vld [vmem:[#allocation5 + $0x3] ss:$0 sm:$0xff]  ;;  %v321_v18 = vmul.f32 %v551_v13, %v273_v3  ;;  %v322_v19 = vmul.f32 %v551_v13, %v274_v4 }
  0x77   : > { %v287_v16 = vadd.f32 %v548_v6, %v281_v7  ;;  %v288_v17 = vadd.f32 %v548_v6, %v282_v8  ;;  %v554_v20 = vld [vmem:[%s1106_s2 + $0x3] ss:$0 sm:$0xff]  ;;  %v341_v23 = vmul.f32 %v553_v15, %v273_v3  ;;  %v342_v24 = vmul.f32 %v553_v15, %v274_v4  ;;  %v555_v52 = vld [vmem:[%s1108_s4] ss:$0 sm:$0xff]  ;;  %s442_s25 = sshll.u32 %s269_s23, 4  ;;  %s565_s27 = sshll.u32 %s875_s22, 8  ;;  %s1055_s25 = int_to_ptr.vmem [resolvable:$true] %s442_s25 }
  0x78   : > { %v307_v21 = vadd.f32 %v550_v10, %v301_v11  ;;  %v308_v22 = vadd.f32 %v550_v10, %v302_v12  ;;  %v327_v27 = vadd.f32 %v552_v14, %v321_v18  ;;  %v328_v28 = vadd.f32 %v552_v14, %v322_v19  ;;  %s1060_s12 = scalar_lea.hbm %s1109_s5, %s565_s27  ;;  %s429_s13 = scalar_lea.sflag [#allocation4], %s1023_s9 }
  0x79   : > { %572 = vmatpush3.bf16.msra.mxu0 %v653_v2  ;;  %v289_v25 = vmul.f32 0.1, %v287_v16  ;;  %v290_v26 = vmul.f32 0.1, %v288_v17  ;;  %v347_v31 = vadd.f32 %v554_v20, %v341_v23  ;;  %v348_v32 = vadd.f32 %v554_v20, %v342_v24  ;;  %s740_s1 = scalar_lea.vmem %s1055_s25, 256  ;;  %p1131_p4 = scmp.ne.s32.totalorder %s1119_s30, 0 }
  0x7a   : > { %v309_v29 = vmul.f32 0.1, %v307_v21  ;;  %v310_v30 = vmul.f32 0.1, %v308_v22  ;;  %v329_v35 = vmul.f32 0.1, %v327_v27  ;;  %p741_p8 = scmp.ne.s32.totalorder %s1055_s25, %s740_s1 }
  0x7b   : > { %v291_v33 = vmax.f32 %v287_v16, %v289_v25  ;;  %v292_v34 = vmax.f32 %v288_v17, %v290_v26  ;;  %v330_v36 = vmul.f32 0.1, %v328_v28  ;;  %v349_v39 = vmul.f32 0.1, %v347_v31  ;;  %s821_s22 = smov [#allocation8]  }
  0x7c   : > { %v311_v37 = vmax.f32 %v307_v21, %v309_v29  ;;  %v312_v38 = vmax.f32 %v308_v22, %v310_v30  ;;  %v350_v40 = vmul.f32 0.1, %v348_v32  ;;  %v331_v41 = vmax.f32 %v327_v27, %v329_v35  ;;  %p742_p5 = pnand %p741_p8, %p1131_p4  ;;  %s744_s29 = sshll.u32 %s821_s22, 4  ;;  %s745_s29 = int_to_ptr.vmem [resolvable:$false] %s744_s29 }
  0x7d   : > { %v332_v42 = vmax.f32 %v328_v28, %v330_v36  ;;  %v351_v45 = vmax.f32 %v347_v31, %v349_v39  ;;  %s746_s7 = scalar_lea.vmem %s745_s29, 512  ;;  %p747_p2 = scmp.lt.s32.totalorder %s1055_s25, %s745_s29 }
  0x7e   : > { %v313_v43 = vadd.f32 %v311_v37, %v291_v33  ;;  %v314_v44 = vadd.f32 %v312_v38, %v292_v34  ;;  %v352_v46 = vmax.f32 %v348_v32, %v350_v40  ;;  %p743_p10 = pneg %p742_p5  ;;  %p748_p0 = scmp.lt.s32.totalorder %s746_s7, %s740_s1 }
  0x80   : > { %v333_v47 = vadd.f32 %v331_v41, %v313_v43  ;;  %v334_v48 = vadd.f32 %v332_v42, %v314_v44  ;;  %p749_p9 = por %p748_p0, %p747_p2 }
  0x82   : > { %v353_v49 = vadd.f32 %v351_v45, %v333_v47  ;;  %v354_v50 = vadd.f32 %v352_v46, %v334_v48  ;;  %p750_p6 = pnand %p749_p9, %p743_p10 }
  0x84   : > { %v355_v51 = vpack.c.bf16 %v354_v50, %v353_v49 }
  0x86   : > { %574 = vmatmul.mubr.msk.bf16.vlgmr.msra.gmra.mrb[0].mxu0 %vm379_vm1, %v355_v51 }
 0x159   : > { %v417_v53 = vpop.f32.mrb[0].mxu0 }
 0x15a   : > { %v418_v54 = vadd.f32 %v555_v52, %v417_v53  ;;  %v575_v55 = vpop.f32.mrb[1].mxu0 }
 0x15b   : > { %v420_v56 = vpop.f32.mrb[2].mxu0 }
 0x15c   : > { %v424_v57 = vmax.f32 %v418_v54, 0.0  ;;  %v421_v58 = vadd.f32 %v555_v52, %v420_v56  ;;  %v576_v59 = vpop.f32.mrb[3].mxu0 }
 0x15e   : > { %426 = vst [vmem:[%s269_s23] sm:$0xff] %v424_v57  ;;  %v425_v60 = vmax.f32 %v421_v58, 0.0 }
 0x160   : > { %427 = vst [vmem:[%s269_s23 + $0x8] sm:$0xff] %v425_v60 }
 0x161   : > { %753 = shalt.err (!%p750_p6)
}
 0x162   : > { %s754_s11 = scalar_lea.hbm %s1060_s12, 256  ;;  %s758_s15 = scalar_lea.hbm %s1109_s5, 512 }
 0x163   : > { %p755_p12 = scmp.ne.s32.totalorder %s1060_s12, %s754_s11  ;;  %p759_p11 = scmp.lt.u32.totalorder %s1060_s12, %s1109_s5 }
 0x164   : > { %p760_p7 = scmp.lt.u32.totalorder %s758_s15, %s754_s11  ;;  %p762_p8 = scmp.lt.u32.totalorder %s754_s11, %s1060_s12 }
 0x165   : > { %p756_p13 = pnand %p755_p12, %p1131_p4 }
 0x166   : > { %p761_p3 = por %p760_p7, %p759_p11 }
 0x167   : > { %p757_p1 = pneg %p756_p13 }
 0x168   : > { %p763_p5 = por %p762_p8, %p761_p3 }
 0x16a   : > { %p764_p10 = pnand %p763_p5, %p757_p1 }
 0x16c   : > { %767 = shalt.err (!%p764_p10)
}
 0x16d   : > { %s822_s17 = smov 128   ;;  %s823_s23 = smov 8  }
 0x16e   : > { %587 = dma.vmem_to_hbm [thread:$0]  (%p1131_p4), %s1055_s25, 256, %s1060_s12, %s429_s13, %s822_s17, %s822_s17, %s823_s23  }
 0x16f PF: > { %s457_s27 = sand.u32 1, %s798_s18   ;;  %p1132_p2 = scmp.ne.s32.totalorder %s1120_s6, 0 }
 0x170   : > { %p1133_p0 = scmp.ge.s32.totalorder %s810_s21, 2  ;;  %s458_s26 = scalar_lea.sflag [#allocation4], %s457_s27 }
 0x172   : > { %p601_p9 = pnand %p1133_p0, %p1132_p2 }
 0x174   : > { %793 = dma.done.wait (!%p601_p9), %s458_s26, 256  }
 0x175   : > { %795 = vsyncadd (!%p601_p9), %s458_s26, 4294967040  ;;  %s1134_s8 = sld [smem:[#allocation12_spill]]  ;;  %p19_p6 = scmp.ge.s32.totalorder %s879_s24, 4  }
 0x176   : > { %s1135_s18 = smov %s802_s19  ;;  %s1136_s19 = smov %s806_s20 }
 0x177   : > { %s1138_s21 = smov %s879_s24  ;;  %21 = sbr.rel (!%p19_p6) target bundleno = 8 (0x8), region = 93 }
 0x17b   : > { %s1137_s20 = smov %s1134_s8 }
 0x17e   :  { %463 = vsyncpa [#allocation3], 1 }
 0x17f   :  { %465 = vsyncpa [#allocation3 + $0x1], 1 }
 0x180   :  { %466 = vsyncpa [#allocation6], 1 }
 0x181   :  { %467 = vsyncpa [#allocation4], 1 }
 0x182   :  { %469 = vsyncpa [#allocation4 + $0x1], 1 }

</bundles_post_ra>
